<compile_context>
chip_gen: v6e
topology: v6e:2x2x1
jax: 0.10.0
libtpu: 0.0.40
codegen_flags: <defaults>
</compile_context>

<pallas_src>
import functools

import jax
import jax.numpy as jnp
from jax.experimental import pallas as pl
from jax.experimental.pallas import tpu as pltpu


def _residual_block_kernel(x_ref, w1_ref, params_ref, w2_ref, b2_ref, o_ref, *, approx_gelu):
    x = x_ref[...]                                    # [TB, F]
    x_f32 = x.astype(jnp.float32)

    # Linear 1 on the MXU: weights already stored in the matmul dtype, f32 accumulation.
    h = jnp.dot(x.astype(w1_ref.dtype), w1_ref[...],
                preferred_element_type=jnp.float32)   # [TB, H]
    params = params_ref[...].astype(jnp.float32)      # [3, H] = (b1, gamma, beta)
    h = h + params[0:1, :]

    # LayerNorm over the hidden dim (eps = 1e-5, PyTorch default), two-pass variance.
    mean = jnp.mean(h, axis=-1, keepdims=True)
    d = h - mean
    var = jnp.mean(d * d, axis=-1, keepdims=True)
    hn = d * jax.lax.rsqrt(var + 1e-5)
    hn = hn * params[1:2, :] + params[2:3, :]

    if approx_gelu:
        # tanh approximation: exp/tanh run on the EUP slot (opt-in fast path).
        g = jax.nn.gelu(hn, approximate=True)
    else:
        # Exact (erf) GELU — matches PyTorch nn.GELU(approximate='none').
        g = 0.5 * hn * (1.0 + jax.lax.erf(hn * jnp.float32(0.7071067811865476)))

    # Linear 2 on the MXU.
    out = jnp.dot(g.astype(w2_ref.dtype), w2_ref[...],
                  preferred_element_type=jnp.float32)  # [TB, F]
    out = out + b2_ref[...].astype(jnp.float32)

    # Residual add in f32, cast to output dtype.
    o_ref[...] = (x_f32 + out).astype(o_ref.dtype)


def _vmem_capacity_bytes():
    try:
        return int(pltpu.get_tpu_info().vmem_capacity_bytes)
    except Exception:
        return 64 * 1024 * 1024  # conservative: v7x per-TensorCore VMEM


def _resident_spec(shape):
    """BlockSpec for an operand that stays VMEM-resident across all grid steps."""
    ndim = len(shape)
    index_map = lambda *_: (0,) * ndim
    try:
        # Constant index -> single buffer is enough; don't pay for double-buffering.
        return pl.BlockSpec(shape, index_map, pipeline_mode=pl.Buffered(1))
    except TypeError:
        return pl.BlockSpec(shape, index_map)


def residual_block(x, w1, b1, gamma, beta, w2, b2, *,
                   matmul_dtype=jnp.bfloat16, approx_gelu=False, batch_tile=None):
    B, F = x.shape
    H = w1.shape[1]

    # Pre-cast weights once (outside the kernel) into the MXU operand dtype.
    w1c = w1.astype(matmul_dtype)
    w2c = w2.astype(matmul_dtype)
    # Pack b1 / gamma / beta into a single [3, H] f32 parameter block.
    params = jnp.concatenate(
        [b1.reshape(1, H), gamma.reshape(1, H), beta.reshape(1, H)], axis=0
    ).astype(jnp.float32)
    b2c = b2.reshape(1, F).astype(jnp.float32)

    x_item = jnp.dtype(x.dtype).itemsize
    w_item = jnp.dtype(matmul_dtype).itemsize

    vmem_cap = _vmem_capacity_bytes()
    budget = int(0.85 * vmem_cap)

    # Resident (single-buffered) operands: two weight matrices + sublane-padded param rows.
    resident_bytes = 2 * F * H * w_item + 8 * H * 4 + 8 * F * 4

    def footprint(tb):
        stream = 2 * 2 * tb * F * x_item          # double-buffered x and out tiles
        interm = 3 * tb * H * 4 + 2 * tb * F * 4  # h / hn / g + f32 out / x copies
        return resident_bytes + stream + interm

    if batch_tile is None:
        batch_tile = 8
        for cand in (512, 256, 128, 64, 32, 16, 8):
            if cand > max(B, 8):
                continue
            # Keep >=2 grid steps when the batch allows (v7x megacore sharding).
            if B >= 16 and B < 2 * cand:
                continue
            if footprint(cand) <= budget:
                batch_tile = cand
                break
    TB = max(1, min(batch_tile, B))
    grid = (pl.cdiv(B, TB),)

    vmem_limit = int(min(max(int(1.25 * footprint(TB)), 16 * 1024 * 1024),
                         max(vmem_cap - 2 * 1024 * 1024, 16 * 1024 * 1024)))

    cost = pl.CostEstimate(
        flops=int(4 * B * F * H + 12 * B * H + 2 * B * F),   # two matmuls + LN/GELU/residual
        transcendentals=int(2 * B * H),                       # erf (or tanh) + rsqrt per hidden elem
        bytes_accessed=int(2 * B * F * x_item + 2 * F * H * w_item + (3 * H + F) * 4),
    )

    kernel = functools.partial(_residual_block_kernel, approx_gelu=approx_gelu)

    return pl.pallas_call(
        kernel,
        out_shape=jax.ShapeDtypeStruct((B, F), x.dtype),
        grid_spec=pltpu.PrefetchScalarGridSpec(
            num_scalar_prefetch=0,
            grid=grid,
            in_specs=[
                pl.BlockSpec((TB, F), lambda i: (i, 0)),   # x: streamed over batch tiles
                _resident_spec((F, H)),                    # w1: VMEM-resident, single-buffered
                _resident_spec((3, H)),                    # packed b1 / gamma / beta
                _resident_spec((H, F)),                    # w2: VMEM-resident, single-buffered
                _resident_spec((1, F)),                    # b2
            ],
            out_specs=pl.BlockSpec((TB, F), lambda i: (i, 0)),
        ),
        compiler_params=pltpu.CompilerParams(
            dimension_semantics=("parallel",),             # shards batch axis on v7x's 2 TCs
            vmem_limit_bytes=vmem_limit,
        ),
        cost_estimate=cost,
    )(x, w1c, params, w2c, b2c)


def reference(x, w1, b1, gamma, beta, w2, b2):
    h = x @ w1 + b1
    mean = jnp.mean(h, axis=-1, keepdims=True)
    var = jnp.mean((h - mean) ** 2, axis=-1, keepdims=True)
    hn = (h - mean) * jax.lax.rsqrt(var + 1e-5)
    hn = hn * gamma + beta
    g = 0.5 * hn * (1.0 + jax.lax.erf(hn / jnp.sqrt(2.0)))
    return x + (g @ w2 + b2)


if __name__ == "__main__":
    # Small shapes consistent with the module: feature_size=256 -> hidden=128, batch=8.
    B, F = 8, 256
    H = F // 2

    key = jax.random.PRNGKey(0)
    kx, kw1, kb1, kw2, kb2 = jax.random.split(key, 5)

    x = jax.random.normal(kx, (B, F), dtype=jnp.float32)

    # Deterministic synthetic parameters (nn.Linear / nn.LayerNorm shapes, weights pre-transposed).
    w1 = jax.random.normal(kw1, (F, H), dtype=jnp.float32) * 0.05     # Linear(F, H) weight.T
    b1 = jax.random.normal(kb1, (H,), dtype=jnp.float32) * 0.05       # Linear(F, H) bias
    gamma = jnp.ones((H,), dtype=jnp.float32)                          # LayerNorm weight
    beta = jnp.zeros((H,), dtype=jnp.float32)                          # LayerNorm bias
    w2 = jax.random.normal(kw2, (H, F), dtype=jnp.float32) * 0.05     # Linear(H, F) weight.T
    b2 = jax.random.normal(kb2, (F,), dtype=jnp.float32) * 0.05       # Linear(H, F) bias

    ref = reference(x, w1, b1, gamma, beta, w2, b2)

    # Exact-precision path (f32 MXU operands): tight check of the module semantics.
    run_f32 = jax.jit(functools.partial(residual_block, matmul_dtype=jnp.float32))
    out_f32 = jax.block_until_ready(run_f32(x, w1, b1, gamma, beta, w2, b2))
    assert out_f32.shape == (B, F)
    assert jnp.allclose(out_f32, ref, atol=1e-4, rtol=1e-4), "f32 path mismatch vs reference"

    # Default fast path (bf16 MXU operands, f32 accumulation): looser tolerance.
    run_bf16 = jax.jit(functools.partial(residual_block, matmul_dtype=jnp.bfloat16))
    out_bf16 = jax.block_until_ready(run_bf16(x, w1, b1, gamma, beta, w2, b2))
    assert out_bf16.shape == (B, F)
    assert jnp.allclose(out_bf16, ref, atol=3e-2, rtol=3e-2), "bf16 path mismatch vs reference"

    print("KERNEL_OK")
</pallas_src>

<mosaic_0001>
module attributes {stable_mosaic.version = 11 : i64} {
  func.func @_residual_block_kernel(%arg0: i32, %arg1: memref<8x256xf32, #tpu.memory_space<vmem>>, %arg2: memref<256x128xf32, #tpu.memory_space<vmem>>, %arg3: memref<3x128xf32, #tpu.memory_space<vmem>>, %arg4: memref<128x256xf32, #tpu.memory_space<vmem>>, %arg5: memref<1x256xf32, #tpu.memory_space<vmem>>, %arg6: memref<8x256xf32, #tpu.memory_space<vmem>>) attributes {dimension_semantics = [#tpu.dimension_semantics<parallel>], iteration_bounds = array<i64: 1>, scalar_prefetch = 0 : i64, scratch_operands = 0 : i64, tpu.core_type = #tpu.core_type<tc>, window_params = [{transform_indices = @transform_0, window_bounds = array<i64: 8, 256>}, {pipeline_mode = #tpu.pipeline_mode<synchronous>, transform_indices = @transform_1, window_bounds = array<i64: 256, 128>}, {pipeline_mode = #tpu.pipeline_mode<synchronous>, transform_indices = @transform_2, window_bounds = array<i64: 3, 128>}, {pipeline_mode = #tpu.pipeline_mode<synchronous>, transform_indices = @transform_3, window_bounds = array<i64: 128, 256>}, {pipeline_mode = #tpu.pipeline_mode<synchronous>, transform_indices = @transform_4, window_bounds = array<i64: 1, 256>}, {transform_indices = @transform_5, window_bounds = array<i64: 8, 256>}]} {
    %c0 = arith.constant 0 : index
    %c0_0 = arith.constant 0 : index
    %0 = vector.load %arg1[%c0, %c0_0] : memref<8x256xf32, #tpu.memory_space<vmem>>, vector<8x256xf32>
    %c0_1 = arith.constant 0 : index
    %c0_2 = arith.constant 0 : index
    %1 = vector.load %arg2[%c0_1, %c0_2] : memref<256x128xf32, #tpu.memory_space<vmem>>, vector<256x128xf32>
    %cst = arith.constant dense<0.000000e+00> : vector<8x128xf32>
    %2 = tpu.matmul %0, %1, %cst {dimension_numbers = #tpu.dot_dimension_numbers<[1], [0], [0], [1], [0, 0, 1, 1], [], []>} : vector<8x256xf32>, vector<256x128xf32>, vector<8x128xf32> -> vector<8x128xf32>
    %c0_3 = arith.constant 0 : index
    %c0_4 = arith.constant 0 : index
    %3 = vector.load %arg3[%c0_3, %c0_4] : memref<3x128xf32, #tpu.memory_space<vmem>>, vector<3x128xf32>
    %4 = vector.extract_strided_slice %3 {offsets = [0, 0], sizes = [1, 128], strides = [1, 1]} : vector<3x128xf32> to vector<1x128xf32>
    %5 = vector.broadcast %4 : vector<1x128xf32> to vector<8x128xf32>
    %6 = arith.addf %2, %5 : vector<8x128xf32>
    %cst_5 = arith.constant dense<0.000000e+00> : vector<8xf32>
    %7 = vector.multi_reduction <add>, %6, %cst_5 [1] : vector<8x128xf32> to vector<8xf32>
    %8 = vector.shape_cast %7 : vector<8xf32> to vector<8x1xf32>
    %cst_6 = arith.constant 1.280000e+02 : f32
    %9 = vector.broadcast %cst_6 : f32 to vector<8x1xf32>
    %10 = arith.divf %8, %9 : vector<8x1xf32>
    %11 = vector.broadcast %10 : vector<8x1xf32> to vector<8x128xf32>
    %12 = arith.subf %6, %11 : vector<8x128xf32>
    %13 = arith.mulf %12, %12 : vector<8x128xf32>
    %cst_7 = arith.constant dense<0.000000e+00> : vector<8xf32>
    %14 = vector.multi_reduction <add>, %13, %cst_7 [1] : vector<8x128xf32> to vector<8xf32>
    %15 = vector.shape_cast %14 : vector<8xf32> to vector<8x1xf32>
    %cst_8 = arith.constant 1.280000e+02 : f32
    %16 = vector.broadcast %cst_8 : f32 to vector<8x1xf32>
    %17 = arith.divf %15, %16 : vector<8x1xf32>
    %cst_9 = arith.constant 9.99999974E-6 : f32
    %18 = vector.broadcast %cst_9 : f32 to vector<8x1xf32>
    %19 = arith.addf %17, %18 : vector<8x1xf32>
    %20 = math.rsqrt %19 : vector<8x1xf32>
    %21 = vector.broadcast %20 : vector<8x1xf32> to vector<8x128xf32>
    %22 = arith.mulf %12, %21 : vector<8x128xf32>
    %23 = vector.extract_strided_slice %3 {offsets = [1, 0], sizes = [1, 128], strides = [1, 1]} : vector<3x128xf32> to vector<1x128xf32>
    %24 = vector.broadcast %23 : vector<1x128xf32> to vector<8x128xf32>
    %25 = arith.mulf %22, %24 : vector<8x128xf32>
    %26 = vector.extract_strided_slice %3 {offsets = [2, 0], sizes = [1, 128], strides = [1, 1]} : vector<3x128xf32> to vector<1x128xf32>
    %27 = vector.broadcast %26 : vector<1x128xf32> to vector<8x128xf32>
    %28 = arith.addf %25, %27 : vector<8x128xf32>
    %cst_10 = arith.constant 5.000000e-01 : f32
    %29 = vector.broadcast %cst_10 : f32 to vector<8x128xf32>
    %30 = arith.mulf %29, %28 : vector<8x128xf32>
    %cst_11 = arith.constant 0.707106769 : f32
    %31 = vector.broadcast %cst_11 : f32 to vector<8x128xf32>
    %32 = arith.mulf %28, %31 : vector<8x128xf32>
    %33 = math.erf %32 : vector<8x128xf32>
    %cst_12 = arith.constant 1.000000e+00 : f32
    %34 = vector.broadcast %cst_12 : f32 to vector<8x128xf32>
    %35 = arith.addf %34, %33 : vector<8x128xf32>
    %36 = arith.mulf %30, %35 : vector<8x128xf32>
    %c0_13 = arith.constant 0 : index
    %c0_14 = arith.constant 0 : index
    %37 = vector.load %arg4[%c0_13, %c0_14] : memref<128x256xf32, #tpu.memory_space<vmem>>, vector<128x256xf32>
    %cst_15 = arith.constant dense<0.000000e+00> : vector<8x256xf32>
    %38 = tpu.matmul %36, %37, %cst_15 {dimension_numbers = #tpu.dot_dimension_numbers<[1], [0], [0], [1], [0, 0, 1, 1], [], []>} : vector<8x128xf32>, vector<128x256xf32>, vector<8x256xf32> -> vector<8x256xf32>
    %c0_16 = arith.constant 0 : index
    %c0_17 = arith.constant 0 : index
    %39 = vector.load %arg5[%c0_16, %c0_17] : memref<1x256xf32, #tpu.memory_space<vmem>>, vector<1x256xf32>
    %40 = vector.broadcast %39 : vector<1x256xf32> to vector<8x256xf32>
    %41 = arith.addf %38, %40 : vector<8x256xf32>
    %42 = arith.addf %0, %41 : vector<8x256xf32>
    %c0_18 = arith.constant 0 : index
    %c0_19 = arith.constant 0 : index
    %43 = vector.load %arg6[%c0_18, %c0_19] : memref<8x256xf32, #tpu.memory_space<vmem>>, vector<8x256xf32>
    tpu.vector_store %arg6[%c0_18, %c0_19], %42 {strides = array<i32>} : memref<8x256xf32, #tpu.memory_space<vmem>>, vector<8x256xf32>,
    return
  }
  func.func @transform_0(%arg0: i32) -> (i32, i32) {
    %c0_i32 = arith.constant 0 : i32
    %c0_i32_0 = arith.constant 0 : i32
    return %arg0, %c0_i32 : i32, i32
  }
  func.func @transform_1(%arg0: i32) -> (i32, i32) {
    %c0_i32 = arith.constant 0 : i32
    %c0_i32_0 = arith.constant 0 : i32
    %c0_i32_1 = arith.constant 0 : i32
    return %c0_i32, %c0_i32_0 : i32, i32
  }
  func.func @transform_2(%arg0: i32) -> (i32, i32) {
    %c0_i32 = arith.constant 0 : i32
    %c0_i32_0 = arith.constant 0 : i32
    %c0_i32_1 = arith.constant 0 : i32
    return %c0_i32, %c0_i32_0 : i32, i32
  }
  func.func @transform_3(%arg0: i32) -> (i32, i32) {
    %c0_i32 = arith.constant 0 : i32
    %c0_i32_0 = arith.constant 0 : i32
    %c0_i32_1 = arith.constant 0 : i32
    return %c0_i32, %c0_i32_0 : i32, i32
  }
  func.func @transform_4(%arg0: i32) -> (i32, i32) {
    %c0_i32 = arith.constant 0 : i32
    %c0_i32_0 = arith.constant 0 : i32
    %c0_i32_1 = arith.constant 0 : i32
    return %c0_i32, %c0_i32_0 : i32, i32
  }
  func.func @transform_5(%arg0: i32) -> (i32, i32) {
    %c0_i32 = arith.constant 0 : i32
    %c0_i32_0 = arith.constant 0 : i32
    return %arg0, %c0_i32 : i32, i32
  }
}

</mosaic_0001>

<bundles_post_ra>
// kernel: residual_block.1
= control target key start
LH: loop header
LB: loop body
LE: loop exit
PB: predicated region body
PF: predicated region fallthrough
CT: control target
= control target key end

     0   :  { %10 = vsyncpa [#allocation3], 0  ;;  %s552_s0 = inlined_call_operand.hbm [shape: f32[8,256], index: 0, kind: input, shape index: {}]   ;;  %s553_s1 = inlined_call_operand.hbm [shape: f32[256,128], index: 1, kind: input, shape index: {}]   ;;  %s554_s2 = inlined_call_operand.vmem [shape: f32[3,128], index: 2, kind: input, shape index: {}]   ;;  %s555_s3 = inlined_call_operand.hbm [shape: f32[128,256], index: 3, kind: input, shape index: {}]   ;;  %s556_s4 = inlined_call_operand.vmem [shape: f32[1,256], index: 4, kind: input, shape index: {}]   ;;  %s557_s5 = inlined_call_operand.hbm [shape: f32[8,256], index: 5, kind: output, shape index: {}]  }
   0x1   :  { %11 = vsyncpa [#allocation6], 0 }
   0x2   :  { %12 = vsyncpa [#allocation4], 0  ;;  %s465_s18 = smov [#allocation5]  }
   0x3   :  { %s28_s19 = sshll.u32 %s465_s18, 4  ;;  %s29_s19 = int_to_ptr.vmem [resolvable:$true] %s28_s19 }
   0x4   :  { %s387_s20 = scalar_lea.vmem %s29_s19, 4096  ;;  %p392_p1 = scmp.lt.s32.totalorder %s29_s19, %s29_s19 }
   0x5   :  { %p388_p0 = scmp.ne.s32.totalorder %s29_s19, %s387_s20  ;;  %p393_p2 = scmp.lt.s32.totalorder %s387_s20, %s387_s20 }
   0x7   :  { %p394_p3 = por %p393_p2, %p392_p1 }
   0x9   :  { %p395_p4 = pnand %p394_p3, %p388_p0 }
   0xb   :  { %398 = shalt.err (!%p395_p4)
}
   0xc   :  { %s466_s21 = smov 128   ;;  %s467_s22 = smov 8  }
   0xd   :  { %34 = dma.hbm_to_vmem [thread:$0]  %s553_s1, 4096, %s29_s19, [#allocation6], %s466_s21, %s466_s21, %s467_s22  }
   0xe   :  { %s468_s25 = smov [#allocation2]   ;;  %s469_s27 = smov [#allocation7]  }
   0xf   :  { %s19_s26 = sshll.u32 %s468_s25, 4  ;;  %s42_s28 = sshll.u32 %s469_s27, 4  ;;  %s20_s26 = int_to_ptr.vmem [resolvable:$true] %s19_s26  ;;  %s43_s28 = int_to_ptr.vmem [resolvable:$true] %s42_s28 }
  0x10   :  { %s407_s29 = scalar_lea.vmem %s20_s26, 256  ;;  %p412_p6 = scmp.lt.s32.totalorder %s20_s26, %s20_s26 }
  0x11   :  { %p408_p5 = scmp.ne.s32.totalorder %s20_s26, %s407_s29  ;;  %p413_p7 = scmp.lt.s32.totalorder %s407_s29, %s407_s29 }
  0x13   :  { %p414_p8 = por %p413_p7, %p412_p6 }
  0x15   :  { %p415_p9 = pnand %p414_p8, %p408_p5 }
  0x17   :  { %418 = shalt.err (!%p415_p9)
}
  0x18   :  { %22 = dma.hbm_to_vmem [thread:$0]  %s552_s0, 256, %s20_s26, [#allocation3]  }
  0x19   :  { %s427_s7 = scalar_lea.vmem %s43_s28, 4096  ;;  %p432_p11 = scmp.lt.s32.totalorder %s43_s28, %s43_s28 }
  0x1a   :  { %p428_p10 = scmp.ne.s32.totalorder %s43_s28, %s427_s7  ;;  %p433_p12 = scmp.lt.s32.totalorder %s427_s7, %s427_s7 }
  0x1c   :  { %p434_p13 = por %p433_p12, %p432_p11 }
  0x1e   :  { %p435_p0 = pnand %p434_p13, %p428_p10 }
  0x20   :  { %438 = shalt.err (!%p435_p0)
}
  0x21   :  { %s470_s1 = smov 256   ;;  %s471_s8 = smov 16  }
  0x22   :  { %48 = dma.hbm_to_vmem [thread:$0]  %s555_s3, 4096, %s43_s28, [#allocation6], %s470_s1, %s470_s1, %s471_s8  }
  0x23   :  { %459 = dma.done.wait [#allocation3], 256  }
  0x24   :  { %460 = vsyncadd [#allocation3], 4294967040 }
  0x25   :  { %461 = dma.done.wait [#allocation6], 8192  }
  0x26   :  { %462 = vsyncadd [#allocation6], 4294959104  ;;  %v93_v0 = vld [vmem:[#allocation5 + $0xf8] sm:$0xff]  ;;  %v92_v2 = vld [vmem:[#allocation5 + $0xf0] sm:$0xff]  ;;  %v95_v34 = vlaneseq  ;;  %v472_v53 = vmov 0.0   ;;  %s473_s12 = smov [#allocation8]  }
  0x27   :  { %v77_v1 = vld [vmem:[#allocation5 + $0x78] sm:$0xff]  ;;  %331 = vmatprep.subr.mxu0 %v93_v0  ;;  %v76_v3 = vld [vmem:[#allocation5 + $0x70] sm:$0xff]  ;;  %v91_v4 = vld [vmem:[#allocation5 + $0xe8] sm:$0xff]  ;;  %304 = vmatprep.mubr.f32.mxu1 %v472_v53  ;;  %s321_s13 = sshll.u32 %s473_s12, 4  ;;  %s322_s13 = int_to_ptr.vmem [resolvable:$true] %s321_s13 }
  0x28   :  { %332 = vmatpush3.msra.mxu0 %v77_v1  ;;  %v75_v5 = vld [vmem:[#allocation5 + $0x68] sm:$0xff]  ;;  %v90_v6 = vld [vmem:[#allocation5 + $0xe0] sm:$0xff]  ;;  %v89_v8 = vld [vmem:[#allocation5 + $0xd8] sm:$0xff]  ;;  %v519_v35 = vshrl.u32 %v95_v34, 7  ;;  %s439_s14 = scalar_lea.vmem %s322_s13, 256  ;;  %p444_p2 = scmp.lt.s32.totalorder %s322_s13, %s322_s13 }
  0x29   :  { %333 = vmatprep.subr.mxu0 %v92_v2  ;;  %v74_v7 = vld [vmem:[#allocation5 + $0x60] sm:$0xff]  ;;  %v73_v9 = vld [vmem:[#allocation5 + $0x58] sm:$0xff]  ;;  %v88_v10 = vld [vmem:[#allocation5 + $0xd0] sm:$0xff]  ;;  %p440_p1 = scmp.ne.s32.totalorder %s322_s13, %s439_s14  ;;  %p445_p3 = scmp.lt.s32.totalorder %s439_s14, %s439_s14 }
  0x2a   :  { %334 = vmatpush3.msra.mxu0 %v76_v3  ;;  %v72_v11 = vld [vmem:[#allocation5 + $0x50] sm:$0xff]  ;;  %v87_v12 = vld [vmem:[#allocation5 + $0xc8] sm:$0xff]  ;;  %v513_v13 = vld [vmem:[#allocation2 + $0x8] sm:$0xff]  ;;  %v188_v36 = vsub.s32 2, %v519_v35  ;;  %v97_v39 = vsub.s32 0, %v519_v35 }
  0x2b   :  { %335 = vmatprep.subr.mxu0 %v91_v4  ;;  %v71_v14 = vld [vmem:[#allocation5 + $0x48] sm:$0xff]  ;;  %163 = vmatprep.mubr.f32.mxu0 %v513_v13  ;;  %v86_v15 = vld [vmem:[#allocation5 + $0xc0] sm:$0xff]  ;;  %v85_v17 = vld [vmem:[#allocation5 + $0xb8] sm:$0xff]  ;;  %p446_p4 = por %p445_p3, %p444_p2 }
  0x2c   :  { %336 = vmatpush3.msra.mxu0 %v75_v5  ;;  %v70_v16 = vld [vmem:[#allocation5 + $0x40] sm:$0xff]  ;;  %v69_v18 = vld [vmem:[#allocation5 + $0x38] sm:$0xff]  ;;  %v84_v19 = vld [vmem:[#allocation5 + $0xb0] sm:$0xff] }
  0x2d   :  { %337 = vmatprep.subr.mxu0 %v90_v6  ;;  %v68_v20 = vld [vmem:[#allocation5 + $0x30] sm:$0xff]  ;;  %v83_v21 = vld [vmem:[#allocation5 + $0xa8] sm:$0xff]  ;;  %v82_v23 = vld [vmem:[#allocation5 + $0xa0] sm:$0xff]  ;;  %p447_p5 = pnand %p446_p4, %p440_p1 }
  0x2e   :  { %338 = vmatpush3.msra.mxu0 %v74_v7  ;;  %v67_v22 = vld [vmem:[#allocation5 + $0x28] sm:$0xff]  ;;  %v66_v24 = vld [vmem:[#allocation5 + $0x20] sm:$0xff]  ;;  %v81_v25 = vld [vmem:[#allocation5 + $0x98] sm:$0xff] }
  0x2f   :  { %339 = vmatprep.subr.mxu0 %v89_v8  ;;  %v65_v26 = vld [vmem:[#allocation5 + $0x18] sm:$0xff]  ;;  %v80_v27 = vld [vmem:[#allocation5 + $0x90] sm:$0xff]  ;;  %v79_v29 = vld [vmem:[#allocation5 + $0x88] sm:$0xff] }
  0x30   :  { %340 = vmatpush3.msra.mxu0 %v73_v9  ;;  %v64_v28 = vld [vmem:[#allocation5 + $0x10] sm:$0xff]  ;;  %v63_v30 = vld [vmem:[#allocation5 + $0x8] sm:$0xff]  ;;  %v78_v31 = vld [vmem:[#allocation5 + $0x80] sm:$0xff] }
  0x31   :  { %341 = vmatprep.subr.mxu0 %v88_v10  ;;  %v62_v32 = vld [vmem:[#allocation5] sm:$0xff]  ;;  %v516_v33 = vld [vmem:[#allocation2] sm:$0xff]  ;;  %v227_v49 = vld [vmem:[#allocation7 + $0xf8] sm:$0xff] }
  0x32   :  { %342 = vmatpush3.msra.mxu0 %v72_v11  ;;  %v525_v37 = vld [vmem:[%s554_s2] sm:$0x7]  ;;  %v225_v51 = vld [vmem:[#allocation7 + $0xe8] sm:$0xff]  ;;  %240 = vmatprep.subr.mxu1 %v227_v49  ;;  %v224_v52 = vld [vmem:[#allocation7 + $0xe0] sm:$0xff] }
  0x33   :  { %343 = vmatprep.subr.mxu0 %v87_v12  ;;  %v528_v38 = vrot.slane %v525_v37, %v188_v36  ;;  %v98_v41 = vrot.slane %v525_v37, %v97_v39  ;;  %v226_v50 = vld [vmem:[#allocation7 + $0xf0] sm:$0xff]  ;;  %v223_v54 = vld [vmem:[#allocation7 + $0xd8] sm:$0xff]  ;;  %v221_v56 = vld [vmem:[#allocation7 + $0xc8] sm:$0xff] }
  0x34   :  { %344 = vmatpush3.msra.mxu0 %v71_v14  ;;  %241 = vmatpush1.msra.mxu1 %v226_v50  ;;  %v222_v55 = vld [vmem:[#allocation7 + $0xd0] sm:$0xff]  ;;  %v220_v57 = vld [vmem:[#allocation7 + $0xc0] sm:$0xff]  ;;  %v219_v58 = vld [vmem:[#allocation7 + $0xb8] sm:$0xff] }
  0x35   :  { %345 = vmatprep.subr.mxu0 %v86_v15  ;;  %242 = vmatprep.subr.mxu1 %v225_v51  ;;  %v218_v59 = vld [vmem:[#allocation7 + $0xb0] sm:$0xff]  ;;  %v217_v60 = vld [vmem:[#allocation7 + $0xa8] sm:$0xff]  ;;  %v216_v61 = vld [vmem:[#allocation7 + $0xa0] sm:$0xff] }
  0x36   :  { %346 = vmatpush3.msra.mxu0 %v70_v16  ;;  %243 = vmatpush1.msra.mxu1 %v224_v52  ;;  %v215_v62 = vld [vmem:[#allocation7 + $0x98] sm:$0xff]  ;;  %v214_v63 = vld [vmem:[#allocation7 + $0x90] sm:$0xff]  ;;  %v213_v0 = vld [vmem:[#allocation7 + $0x88] sm:$0xff] }
  0x37   :  { %347 = vmatprep.subr.mxu0 %v85_v17  ;;  %244 = vmatprep.subr.mxu1 %v223_v54  ;;  %v212_v1 = vld [vmem:[#allocation7 + $0x80] sm:$0xff]  ;;  %v211_v2 = vld [vmem:[#allocation7 + $0x78] sm:$0xff]  ;;  %v210_v3 = vld [vmem:[#allocation7 + $0x70] sm:$0xff] }
  0x38   :  { %348 = vmatpush3.msra.mxu0 %v69_v18  ;;  %245 = vmatpush1.msra.mxu1 %v222_v55  ;;  %v209_v4 = vld [vmem:[#allocation7 + $0x68] sm:$0xff]  ;;  %v208_v5 = vld [vmem:[#allocation7 + $0x60] sm:$0xff]  ;;  %v207_v6 = vld [vmem:[#allocation7 + $0x58] sm:$0xff] }
  0x39   :  { %349 = vmatprep.subr.mxu0 %v84_v19  ;;  %246 = vmatprep.subr.mxu1 %v221_v56  ;;  %v206_v7 = vld [vmem:[#allocation7 + $0x50] sm:$0xff]  ;;  %v205_v8 = vld [vmem:[#allocation7 + $0x48] sm:$0xff]  ;;  %v204_v9 = vld [vmem:[#allocation7 + $0x40] sm:$0xff] }
  0x3a   :  { %350 = vmatpush3.msra.mxu0 %v68_v20  ;;  %247 = vmatpush1.msra.mxu1 %v220_v57  ;;  %v203_v10 = vld [vmem:[#allocation7 + $0x38] sm:$0xff]  ;;  %v202_v11 = vld [vmem:[#allocation7 + $0x30] sm:$0xff]  ;;  %v201_v12 = vld [vmem:[#allocation7 + $0x28] sm:$0xff] }
  0x3b   :  { %351 = vmatprep.subr.mxu0 %v83_v21  ;;  %248 = vmatprep.subr.mxu1 %v219_v58  ;;  %v200_v14 = vld [vmem:[#allocation7 + $0x20] sm:$0xff]  ;;  %v199_v15 = vld [vmem:[#allocation7 + $0x18] sm:$0xff]  ;;  %v198_v16 = vld [vmem:[#allocation7 + $0x10] sm:$0xff] }
  0x3c   :  { %352 = vmatpush3.msra.mxu0 %v67_v22  ;;  %249 = vmatpush1.msra.mxu1 %v218_v59  ;;  %v197_v17 = vld [vmem:[#allocation7 + $0x8] sm:$0xff]  ;;  %v196_v18 = vld [vmem:[#allocation7] sm:$0xff]  ;;  %v183_v22 = vsub.s32 1, %v519_v35  ;;  %v228_v34 = vld [vmem:[%s556_s4] sm:$0x3] }
  0x3d   :  { %353 = vmatprep.subr.mxu0 %v82_v23  ;;  %250 = vmatprep.subr.mxu1 %v217_v60  ;;  %v233_v36 = vrot.slane %v228_v34, %v97_v39 }
  0x3e   :  { %354 = vmatpush3.msra.mxu0 %v66_v24  ;;  %251 = vmatpush1.msra.mxu1 %v216_v61  ;;  %v184_v23 = vrot.slane %v525_v37, %v183_v22  ;;  %v237_v37 = vrot.slane %v228_v34, %v183_v22 }
  0x3f   :  { %355 = vmatprep.subr.mxu0 %v81_v25  ;;  %252 = vmatprep.subr.mxu1 %v215_v62 }
  0x40   :  { %356 = vmatpush3.msra.mxu0 %v65_v26  ;;  %253 = vmatpush1.msra.mxu1 %v214_v63 }
  0x41   :  { %357 = vmatprep.subr.mxu0 %v80_v27  ;;  %254 = vmatprep.subr.mxu1 %v213_v0 }
  0x42   :  { %358 = vmatpush3.msra.mxu0 %v64_v28  ;;  %255 = vmatpush1.msra.mxu1 %v212_v1 }
  0x43   :  { %359 = vmatprep.subr.mxu0 %v79_v29  ;;  %256 = vmatprep.subr.mxu1 %v211_v2 }
  0x44   :  { %360 = vmatpush3.msra.mxu0 %v63_v30  ;;  %257 = vmatpush1.msra.mxu1 %v210_v3 }
  0x45   :  { %361 = vmatprep.subr.mxu0 %v78_v31  ;;  %258 = vmatprep.subr.mxu1 %v209_v4 }
  0x46   :  { %362 = vmatpush3.msra.mxu0 %v62_v32  ;;  %259 = vmatpush1.msra.mxu1 %v208_v5 }
  0x47   :  { %164 = vmatmul.mubr.f32.vlgmr.msra.gmra.mxu0 %v516_v33  ;;  %260 = vmatprep.subr.mxu1 %v207_v6 }
  0x48   :  { %261 = vmatpush1.msra.mxu1 %v206_v7 }
  0x49   :  { %262 = vmatprep.subr.mxu1 %v205_v8 }
  0x4a   :  { %263 = vmatpush1.msra.mxu1 %v204_v9 }
  0x4b   :  { %264 = vmatprep.subr.mxu1 %v203_v10 }
  0x4c   :  { %265 = vmatpush1.msra.mxu1 %v202_v11 }
  0x4d   :  { %266 = vmatprep.subr.mxu1 %v201_v12 }
  0x4e   :  { %267 = vmatpush1.msra.mxu1 %v200_v14 }
  0x4f   :  { %268 = vmatprep.subr.mxu1 %v199_v15 }
  0x50   :  { %269 = vmatpush1.msra.mxu1 %v198_v16 }
  0x51   :  { %270 = vmatprep.subr.mxu1 %v197_v17 }
  0x52   :  { %271 = vmatpush1.msra.mxu1 %v196_v18 }
 0x107   :  { %v363_v40 = vpop.f32.mrf.mxu0 }
 0x109   :  { %v364_v42 = vpop.f32.mrf.mxu0 }
 0x10a   :  { %v365_v43 = vadd.f32 %v364_v42, %v363_v40 }
 0x10c   :  { %v166_v44 = vadd.f32 %v365_v43, %v98_v41 }
 0x10e   :  { %169 = vadd.xlane.f32.xlu0 %v166_v44 }
 0x197   :  { %v170_v45 = vpop.xlane.xlu0 %169 }
 0x198   :  { %v172_v46 = vmul.f32 0.0078125, %v170_v45 }
 0x19a   :  { %v534_v47 = vsub.f32 %v166_v44, %v172_v46 }
 0x19c   :  { %v174_v48 = vmul.f32 %v534_v47, %v534_v47 }
 0x19e   :  { %175 = vadd.xlane.f32.xlu0 %v174_v48 }
 0x227   :  { %v176_v19 = vpop.xlane.xlu0 %175 }
 0x228   :  { %v177_v20 = vmul.f32 0.0078125, %v176_v19 }
 0x22a   :  { %v178_v21 = vadd.f32 1e-05, %v177_v20 }
 0x22c   :  { %375 = vrsqrt.f32 %v178_v21 }
 0x239   :  { %v376_v24 = vpop.eup %375 }
 0x23a   :  { %v180_v25 = vmul.f32 %v376_v24, %v534_v47 }
 0x23c   :  { %v185_v26 = vmul.f32 %v184_v23, %v180_v25 }
 0x23e   :  { %v190_v27 = vadd.f32 %v528_v38, %v185_v26 }
 0x240   :  { %v192_v28 = vmul.f32 0.70710677, %v190_v27  ;;  %v191_v30 = vmul.f32 0.5, %v190_v27 }
 0x242   :  { %377 = verf.f32 %v192_v28 }
 0x24f   :  { %v378_v29 = vpop.eup %377 }
 0x250   :  { %v194_v31 = vadd.f32 1.0, %v378_v29 }
 0x252   :  { %v195_v32 = vmul.f32 %v194_v31, %v191_v30 }
 0x254   :  { %305 = vmatmul.mubr.f32.vlgmr.msra.gmra.mxu1 %v195_v32 }
 0x314   :  { %v306_v40 = vpop.f32.mrf.mxu1 }
 0x315   :  { %v307_v41 = vadd.f32 %v306_v40, %v233_v36 }
 0x316   :  { %v308_v42 = vpop.f32.mrf.mxu1 }
 0x317   :  { %v311_v38 = vadd.f32 %v307_v41, %v516_v33  ;;  %v309_v43 = vadd.f32 %v308_v42, %v237_v37 }
 0x319   :  { %313 = vst [vmem:[#allocation8] sm:$0xff] %v311_v38  ;;  %v312_v44 = vadd.f32 %v309_v43, %v513_v13 }
 0x31b   :  { %314 = vst [vmem:[#allocation8 + $0x8] sm:$0xff] %v312_v44 }
 0x31c   :  { %450 = shalt.err (!%p447_p5)
}
 0x31d   :  { %324 = dma.vmem_to_hbm [thread:$0]  %s322_s13, 256, %s557_s5, [#allocation4]  }
 0x31e   :  { %463 = dma.done.wait [#allocation4], 256  }
 0x31f   :  { %464 = vsyncadd [#allocation4], 4294967040 }
 0x320   :  { %328 = vsyncpa [#allocation3], 1 }
 0x321   :  { %329 = vsyncpa [#allocation6], 1 }
 0x322   :  { %330 = vsyncpa [#allocation4], 1 }

</bundles_post_ra>
